<compile_context>
chip_gen: v7x
topology: tpu7x:2x2x1
jax: 0.10.0
libtpu: 0.0.40
codegen_flags: <defaults>
</compile_context>

<pallas_src>
import jax
import jax.numpy as jnp
from jax.experimental import pallas as pl
from jax.experimental.pallas import tpu as pltpu


def _aspp_pool_kernel(x_ref, w_ref, bias_ref, o_ref, acc_ref):
    # x_ref:    (TC, HW)    channel tile of the current sample (batch squeezed)
    # w_ref:    (Cout, TC)  1x1-conv weight tile with BN scale and 1/HW folded in
    # bias_ref: (Cout, 1)   folded BN bias = beta - running_mean * gamma/sqrt(var+eps)
    # o_ref:    (Cout, HW)  output row for the current sample (batch squeezed)
    # acc_ref:  (Cout, 1)   f32 accumulator, persists across the Cin-tile axis
    k = pl.program_id(1)

    @pl.when(k == 0)
    def _init():
        acc_ref[...] = jnp.zeros_like(acc_ref)

    # Per-tile sum over H*W (f32), then this tile's partial contribution to the
    # (already 1/HW- and BN-scale-folded) 1x1-conv matvec.
    s = jnp.sum(x_ref[...].astype(jnp.float32), axis=1, keepdims=True)   # (TC, 1)
    acc_ref[...] += jnp.dot(w_ref[...], s,
                            preferred_element_type=jnp.float32)          # (Cout, 1)

    @pl.when(k == pl.num_programs(1) - 1)
    def _finalize():
        y = jnp.maximum(acc_ref[...] + bias_ref[...], 0.0)               # BN + ReLU
        # Bilinear upsample of a 1x1 map (align_corners=True) == constant
        # broadcast; one full-HW lane-dense store per sample.
        o_ref[...] = jnp.broadcast_to(y, o_ref.shape).astype(o_ref.dtype)


def _choose_cin_tile(cin, hw, itemsize):
    """Pick a Cin tile so the double-buffered x block stays <= ~8 MiB."""
    budget = 8 * 1024 * 1024
    if 2 * cin * hw * itemsize <= budget:
        return cin                       # whole channel extent in one step
    # Largest multiple-of-128 divisor of Cin that fits the budget (128-aligned
    # so the (Cout, TC) weight block last dim satisfies the lane-tiling rule).
    best = None
    t = 128
    while t <= cin:
        if cin % t == 0 and 2 * t * hw * itemsize <= budget:
            best = t
        t += 128
    if best is not None:
        return best
    if cin % 128 == 0:
        return 128
    return cin                           # rare fallback: un-tiled


def aspp_pooling(x, conv_w, bn_gamma, bn_beta, bn_mean, bn_var, eps=1e-5, *,
                 cin_tile=None):
    """x: (N, Cin, H, W) -> (N, Cout, H, W), same dtype as x."""
    n, cin, h, w = x.shape
    cout = conv_w.shape[0]
    hw = h * w

    # Contiguous reshape: free, no extra HBM pass.
    x_flat = x.reshape(n, cin, hw)

    # Fold BN (inference stats) and the 1/HW mean factor into the conv weight,
    # and BN shift into a bias vector. All done once on the host in f32.
    scale = (bn_gamma.astype(jnp.float32)
             / jnp.sqrt(bn_var.astype(jnp.float32) + eps))               # (Cout,)
    w_folded = (conv_w.reshape(cout, cin).astype(jnp.float32)
                * scale[:, None]) * (1.0 / float(hw))                    # (Cout, Cin)
    bias = (bn_beta.astype(jnp.float32)
            - bn_mean.astype(jnp.float32) * scale).reshape(cout, 1)      # (Cout, 1)

    tc = _choose_cin_tile(cin, hw, x.dtype.itemsize) if cin_tile is None else cin_tile
    assert cin % tc == 0, "Cin tile must divide Cin"
    assert tc == cin or tc % 128 == 0, "tiled Cin blocks must be 128-aligned"
    kt = cin // tc

    out_flat = pl.pallas_call(
        _aspp_pool_kernel,
        out_shape=jax.ShapeDtypeStruct((n, cout, hw), x.dtype),
        grid_spec=pltpu.PrefetchScalarGridSpec(
            num_scalar_prefetch=0,
            grid=(n, kt),                                   # reduction axis last
            in_specs=[
                pl.BlockSpec((pl.Squeezed(), tc, hw), lambda i, k: (i, k, 0)),
                pl.BlockSpec((cout, tc), lambda i, k: (0, k)),
                pl.BlockSpec((cout, 1), lambda i, k: (0, 0)),
            ],
            out_specs=pl.BlockSpec((pl.Squeezed(), cout, hw),
                                   lambda i, k: (i, 0, 0)),
            scratch_shapes=[pltpu.VMEM((cout, 1), jnp.float32)],
        ),
        compiler_params=pltpu.CompilerParams(
            dimension_semantics=("parallel", "arbitrary"),
            # Headroom over the per-generation defaults (16/32/32 MiB) while
            # staying well under v7x's 64 MiB physical VMEM per TensorCore.
            vmem_limit_bytes=48 * 1024 * 1024,
        ),
        cost_estimate=pl.CostEstimate(
            flops=int(2 * n * cout * cin),
            transcendentals=0,
            bytes_accessed=int(x.dtype.itemsize * n * (cin + cout) * hw
                               + 4 * cout * cin),
        ),
    )(x_flat, w_folded, bias)

    return out_flat.reshape(n, cout, h, w)


def _reference(x, conv_w, bn_gamma, bn_beta, bn_mean, bn_var, eps=1e-5):
    # Pure-JAX reference of the same math (f32).
    n, cin, h, w = x.shape
    cout = conv_w.shape[0]
    pooled = jnp.mean(x.astype(jnp.float32), axis=(2, 3))          # (N, Cin)
    z = pooled @ conv_w.reshape(cout, cin).astype(jnp.float32).T   # (N, Cout)
    zbn = bn_gamma * (z - bn_mean) / jnp.sqrt(bn_var + eps) + bn_beta
    y = jnp.maximum(zbn, 0.0)
    return jnp.broadcast_to(y[:, :, None, None], (n, cout, h, w))


if __name__ == "__main__":
    key = jax.random.PRNGKey(0)
    k_x, k_w, k_g, k_b, k_m, k_v, k_x2, k_w2 = jax.random.split(key, 8)

    # --- small shapes consistent with the module (single Cin tile) -------
    N, CIN, COUT, H, W = 2, 4, 8, 16, 16
    x = jax.random.normal(k_x, (N, CIN, H, W), dtype=jnp.float32)
    conv_w = jax.random.normal(k_w, (COUT, CIN, 1, 1), dtype=jnp.float32) * 0.1
    bn_gamma = 1.0 + 0.1 * jax.random.normal(k_g, (COUT,), dtype=jnp.float32)
    bn_beta = 0.1 * jax.random.normal(k_b, (COUT,), dtype=jnp.float32)
    bn_mean = 0.05 * jax.random.normal(k_m, (COUT,), dtype=jnp.float32)
    bn_var = jnp.abs(jax.random.normal(k_v, (COUT,), dtype=jnp.float32)) + 0.5

    out = jax.block_until_ready(
        aspp_pooling(x, conv_w, bn_gamma, bn_beta, bn_mean, bn_var))
    ref = _reference(x, conv_w, bn_gamma, bn_beta, bn_mean, bn_var)
    assert out.shape == (N, COUT, H, W)
    assert jnp.allclose(out, ref, atol=1e-5, rtol=1e-5), "mismatch (single tile)"

    # --- exercise the tiled-Cin accumulator path (2 channel tiles) -------
    CIN2 = 256
    x2 = jax.random.normal(k_x2, (N, CIN2, H, W), dtype=jnp.float32)
    conv_w2 = jax.random.normal(k_w2, (COUT, CIN2, 1, 1), dtype=jnp.float32) * 0.05
    out2 = jax.block_until_ready(
        aspp_pooling(x2, conv_w2, bn_gamma, bn_beta, bn_mean, bn_var, cin_tile=128))
    ref2 = _reference(x2, conv_w2, bn_gamma, bn_beta, bn_mean, bn_var)
    assert jnp.allclose(out2, ref2, atol=1e-4, rtol=1e-4), "mismatch (tiled Cin)"

    # --- bf16 activations: bf16 in/out, f32 accumulation inside ----------
    x_bf16 = x.astype(jnp.bfloat16)
    out_bf = jax.block_until_ready(
        aspp_pooling(x_bf16, conv_w, bn_gamma, bn_beta, bn_mean, bn_var))
    ref_bf = _reference(x_bf16.astype(jnp.float32), conv_w, bn_gamma, bn_beta,
                        bn_mean, bn_var)
    assert out_bf.dtype == jnp.bfloat16
    assert jnp.allclose(out_bf.astype(jnp.float32), ref_bf, atol=2e-2, rtol=2e-2), \
        "mismatch (bf16)"

    print("KERNEL_OK")
</pallas_src>

<mosaic_0001>
module attributes {stable_mosaic.version = 11 : i64} {
  func.func @_aspp_pool_kernel(%arg0: i32, %arg1: i32, %arg2: memref<1x4x256xf32, #tpu.memory_space<vmem>>, %arg3: memref<8x4xf32, #tpu.memory_space<vmem>>, %arg4: memref<8x1xf32, #tpu.memory_space<vmem>>, %arg5: memref<1x8x256xf32, #tpu.memory_space<vmem>>, %arg6: memref<8x1xf32, #tpu.memory_space<vmem>>) attributes {dimension_semantics = [#tpu.dimension_semantics<parallel>, #tpu.dimension_semantics<arbitrary>], iteration_bounds = array<i64: 2, 1>, scalar_prefetch = 0 : i64, scratch_operands = 1 : i64, tpu.core_type = #tpu.core_type<tc>, window_params = [{transform_indices = @transform_0, window_bounds = array<i64: 1, 4, 256>}, {transform_indices = @transform_1, window_bounds = array<i64: 8, 4>}, {pipeline_mode = #tpu.pipeline_mode<synchronous>, transform_indices = @transform_2, window_bounds = array<i64: 8, 1>}, {transform_indices = @transform_3, window_bounds = array<i64: 1, 8, 256>}]} {
    %c0_i32 = arith.constant 0 : i32
    %0 = arith.cmpi eq, %arg1, %c0_i32 : i32
    %1 = arith.extui %0 : i1 to i32
    %c0_i32_0 = arith.constant 0 : i32
    %2 = arith.cmpi ne, %1, %c0_i32_0 : i32
    scf.if %2 {
      %cst_12 = arith.constant 0.000000e+00 : f32
      %15 = vector.broadcast %cst_12 : f32 to vector<8x1xf32>
      %c0_13 = arith.constant 0 : index
      %c0_14 = arith.constant 0 : index
      %16 = vector.load %arg6[%c0_13, %c0_14] : memref<8x1xf32, #tpu.memory_space<vmem>>, vector<8x1xf32>
      tpu.vector_store %arg6[%c0_13, %c0_14], %15 {strides = array<i32>} : memref<8x1xf32, #tpu.memory_space<vmem>>, vector<8x1xf32>,
    } else {
    }
    %c0 = arith.constant 0 : index
    %c0_1 = arith.constant 0 : index
    %c0_2 = arith.constant 0 : index
    %3 = vector.load %arg2[%c0, %c0_1, %c0_2] : memref<1x4x256xf32, #tpu.memory_space<vmem>>, vector<1x4x256xf32>
    %4 = vector.shape_cast %3 : vector<1x4x256xf32> to vector<4x256xf32>
    %cst = arith.constant dense<0.000000e+00> : vector<4xf32>
    %5 = vector.multi_reduction <add>, %4, %cst [1] : vector<4x256xf32> to vector<4xf32>
    %6 = vector.shape_cast %5 : vector<4xf32> to vector<4x1xf32>
    %c0_3 = arith.constant 0 : index
    %c0_4 = arith.constant 0 : index
    %7 = vector.load %arg6[%c0_3, %c0_4] : memref<8x1xf32, #tpu.memory_space<vmem>>, vector<8x1xf32>
    %c0_5 = arith.constant 0 : index
    %c0_6 = arith.constant 0 : index
    %8 = vector.load %arg3[%c0_5, %c0_6] : memref<8x4xf32, #tpu.memory_space<vmem>>, vector<8x4xf32>
    %cst_7 = arith.constant dense<0.000000e+00> : vector<8x1xf32>
    %9 = tpu.matmul %8, %6, %cst_7 {dimension_numbers = #tpu.dot_dimension_numbers<[1], [0], [0], [1], [0, 0, 1, 1], [], []>} : vector<8x4xf32>, vector<4x1xf32>, vector<8x1xf32> -> vector<8x1xf32>
    %10 = arith.addf %7, %9 : vector<8x1xf32>
    %c0_8 = arith.constant 0 : index
    %c0_9 = arith.constant 0 : index
    %11 = vector.load %arg6[%c0_8, %c0_9] : memref<8x1xf32, #tpu.memory_space<vmem>>, vector<8x1xf32>
    tpu.vector_store %arg6[%c0_8, %c0_9], %10 {strides = array<i32>} : memref<8x1xf32, #tpu.memory_space<vmem>>, vector<8x1xf32>,
    %c0_i32_10 = arith.constant 0 : i32
    %12 = arith.cmpi eq, %arg1, %c0_i32_10 : i32
    %13 = arith.extui %12 : i1 to i32
    %c0_i32_11 = arith.constant 0 : i32
    %14 = arith.cmpi ne, %13, %c0_i32_11 : i32
    scf.if %14 {
      %c0_12 = arith.constant 0 : index
      %c0_13 = arith.constant 0 : index
      %15 = vector.load %arg6[%c0_12, %c0_13] : memref<8x1xf32, #tpu.memory_space<vmem>>, vector<8x1xf32>
      %c0_14 = arith.constant 0 : index
      %c0_15 = arith.constant 0 : index
      %16 = vector.load %arg4[%c0_14, %c0_15] : memref<8x1xf32, #tpu.memory_space<vmem>>, vector<8x1xf32>
      %17 = arith.addf %15, %16 : vector<8x1xf32>
      %cst_16 = arith.constant 0.000000e+00 : f32
      %18 = vector.broadcast %cst_16 : f32 to vector<8x1xf32>
      %19 = arith.maximumf %17, %18 : vector<8x1xf32>
      %20 = vector.shape_cast %19 : vector<8x1xf32> to vector<8x1xf32>
      %21 = vector.broadcast %20 : vector<8x1xf32> to vector<8x256xf32>
      %c0_17 = arith.constant 0 : index
      %c0_18 = arith.constant 0 : index
      %c0_19 = arith.constant 0 : index
      %22 = vector.load %arg5[%c0_17, %c0_18, %c0_19] : memref<1x8x256xf32, #tpu.memory_space<vmem>>, vector<1x8x256xf32>
      %23 = vector.shape_cast %22 : vector<1x8x256xf32> to vector<8x256xf32>
      %24 = vector.shape_cast %21 : vector<8x256xf32> to vector<1x8x256xf32>
      tpu.vector_store %arg5[%c0_17, %c0_18, %c0_19], %24 {strides = array<i32>} : memref<1x8x256xf32, #tpu.memory_space<vmem>>, vector<1x8x256xf32>,
    } else {
    }
    return
  }
  func.func @transform_0(%arg0: i32, %arg1: i32) -> (i32, i32, i32) {
    %c0_i32 = arith.constant 0 : i32
    %c0_i32_0 = arith.constant 0 : i32
    return %arg0, %arg1, %c0_i32 : i32, i32, i32
  }
  func.func @transform_1(%arg0: i32, %arg1: i32) -> (i32, i32) {
    %c0_i32 = arith.constant 0 : i32
    %c0_i32_0 = arith.constant 0 : i32
    return %c0_i32, %arg1 : i32, i32
  }
  func.func @transform_2(%arg0: i32, %arg1: i32) -> (i32, i32) {
    %c0_i32 = arith.constant 0 : i32
    %c0_i32_0 = arith.constant 0 : i32
    %c0_i32_1 = arith.constant 0 : i32
    return %c0_i32, %c0_i32_0 : i32, i32
  }
  func.func @transform_3(%arg0: i32, %arg1: i32) -> (i32, i32, i32) {
    %c0_i32 = arith.constant 0 : i32
    %c0_i32_0 = arith.constant 0 : i32
    %c0_i32_1 = arith.constant 0 : i32
    return %arg0, %c0_i32, %c0_i32_0 : i32, i32, i32
  }
}

</mosaic_0001>

<bundles_post_ra>
// kernel: tpu_custom_call.1
= control target key start
LH: loop header
LB: loop body
LE: loop exit
PB: predicated region body
PF: predicated region fallthrough
CT: control target
= control target key end

     0   :  { %8 = vsyncpa [#allocation4], 0  ;;  %s739_s0 = inlined_call_operand.vmem [shape: f32[2,4,256], index: 0, kind: input, shape index: {}]   ;;  %s740_s1 = inlined_call_operand.vmem [shape: f32[8,4], index: 1, kind: input, shape index: {}]   ;;  %s741_s2 = inlined_call_operand.vmem [shape: f32[8,1], index: 2, kind: input, shape index: {}]   ;;  %s742_s3 = inlined_call_operand.hbm [shape: f32[2,8,256], index: 3, kind: output, shape index: {}]  }
   0x1   :  { %10 = vsyncpa [#allocation4 + $0x1], 0  ;;  %s619_s12 = smov 0   ;;  %s621_s13 = smov 0  }
   0x2   :  { %s623_s14 = smov 0   ;;  %s625_s15 = smov 0  }
   0x3   :  { %s627_s16 = smov 0   ;;  %s629_s17 = smov 0  }
   0x4 LB: > { %s430_s18 = sadd.s32 4294967295, %s593_s17   ;;  %s431_s19 = sadd.s32 4294967294, %s593_s17   ;;  %s593_s17 = sphi %s629_s17, %s16_s17   ;;  %s589_s16 = sphi %s627_s16, %s749_s16   ;;  %s585_s15 = sphi %s625_s15, %s748_s15   ;;  %s581_s14 = sphi %s623_s14, %s747_s14   ;;  %s577_s13 = sphi %s621_s13, %s746_s13   ;;  %s573_s12 = sphi %s619_s12, %s745_s12  }
   0x5   : > { %s28_s20 = sadd.s32 1, %s589_s16  ;;  %s110_s21 = sadd.s32 1, %s581_s14 }
   0x6   : > { %p30_p0 = scmp.ge.s32.totalorder %s28_s20, 2  ;;  %p120_p1 = scmp.ne.s32.totalorder %s581_s14, %s577_s13 }
   0x7   : > { %p121_p2 = scmp.eq.s32.totalorder %s430_s18, 1  ;;  %p126_p3 = scmp.ne.s32.totalorder %s577_s13, %s573_s12 }
   0x8   : > { %s751_s20 = smov (%p30_p0, %s28_s20), 0  ;;  %p127_p5 = scmp.eq.s32.totalorder %s431_s19, 1 }
   0x9   : > { %p659_p4 = por %p121_p2, %p120_p1  ;;  %s107_s23 = ssub.s32 %s589_s16, %s751_s20 }
   0xa   : > { %p435_p6 = scmp.ge.s32.totalorder %s593_s17, 1  ;;  %p108_p7 = scmp.eq.s32.totalorder %s107_s23, 0 }
   0xb   : > { %p666_p8 = por %p127_p5, %p126_p3  ;;  %p167_p9 = scmp.lt.s32.totalorder %s593_s17, 3 }
   0xc   : > { %s672_s25 = scalar_select %p108_p7, %s581_s14, %s110_s21  }
   0xd   : > { %p168_p10 = pnand %p435_p6, %p167_p9 }
   0xe   : > { %p199_p11 = scmp.lt.s32.totalorder (!%p168_p10), %s585_s15, 1  ;;  %vm216_vm0 = vcmask (!%p168_p10), 7168   ;;  %v595_v0 = vmov (!%p168_p10), 0.0   ;;  %vm222_vm1 = vcmask (!%p168_p10), 1043456   ;;  %vm596_vm2 = vmmov (!%p168_p10), 0   ;;  %v229_v6 = vld [vmem:[%s740_s1] sm:$0xff] (!%p168_p10) }
   0xf   : > { %171 = sbr.rel (%p168_p10) target bundleno = 543 (0x21f), region = 32  ;;  %217 = vst.msk [vmem:[#allocation2] sm:$0xff] (!%p168_p10), %vm216_vm0, %v595_v0  ;;  %450 = vmatprep.subr.mxu0 (!%p168_p10), %v595_v0  ;;  %452 = vmatprep.mubr.msk.f32.mxu0 (!%p168_p10), %vm596_vm2, %v595_v0  ;;  %vm230_vm3 = vcmask (!%p168_p10), 31744   ;;  %v597_v8 = vmov (!%p168_p10), 0   ;;  %v314_v13 = vld [vmem:[%s741_s2] sm:$0xff] (!%p168_p10)  ;;  %s196_s8 = sand.u32 (!%p168_p10), 1, %s577_s13  }
  0x10   : > { %513 = vset.pattern.permute.xlu0 (!%p168_p10), %v597_v8  ;;  %s436_s9 = sshll.u32 (!%p168_p10), %s196_s8, 4  ;;  %s447_s18 = sshll.u32 (!%p168_p10), %s585_s15, 8 }
  0x11   : > { %s198_s10 = scalar_lea.vmem (!%p168_p10), [#allocation3], %s436_s9  ;;  %s694_s23 = scalar_lea.hbm (!%p168_p10), %s742_s3, %s447_s18 }
  0x12   : > { %s339_s11 = sshll.u32 (!%p168_p10), %s198_s10, 4  ;;  %s689_s11 = int_to_ptr.vmem [resolvable:$true] %s339_s11 }
  0x16   : > { %s200_s26 = scalar_select %p199_p11, %s585_s15, 1  ;;  %v228_v9 = vld [vmem:[#allocation2] sm:$0xff] }
  0x17   : > { %s598_s15 = smov [#allocation3]  }
  0x18   : > { %s446_s27 = sshll.u32 %s200_s26, 3  ;;  %s325_s26 = scalar_lea.sflag [#allocation4], %s196_s8 }
  0x19   : > { %s207_s30 = scalar_lea.vmem %s739_s0, %s446_s27  ;;  %s515_s27 = scalar_lea.vmem %s689_s11, 256 }
  0x1a   : > { %v218_v1 = vld [vmem:[%s207_s30] sm:$0xff]  ;;  %p516_p12 = scmp.ne.s32.totalorder %s689_s11, %s515_s27  ;;  %s519_s28 = sshll.u32 %s598_s15, 4  ;;  %s520_s28 = int_to_ptr.vmem [resolvable:$false] %s519_s28 }
  0x1b   : > { %v220_v2 = vcombine.high %v218_v1, %v218_v1  ;;  %v223_v3 = vsel %vm222_vm1, %v218_v1, 0.0  ;;  %s521_s29 = scalar_lea.vmem %s520_s28, 512  ;;  %p522_p1 = scmp.lt.s32.totalorder %s689_s11, %s520_s28 }
  0x1c   : > { %p517_p13 = pnand %p516_p12, %p659_p4  ;;  %p523_p2 = scmp.lt.s32.totalorder %s521_s29, %s515_s27 }
  0x1d   : > { %v224_v4 = vsel %vm222_vm1, %v220_v2, 0.0 }
  0x1e   : > { %v225_v5 = vadd.f32 %v224_v4, %v223_v3  ;;  %p518_p0 = pneg %p517_p13  ;;  %p524_p3 = por %p523_p2, %p522_p1 }
  0x20   : > { %226 = vadd.xlane.f32.xlu0 %v225_v5  ;;  %p525_p5 = pnand %p524_p3, %p518_p0 }
  0xad   : > { %v227_v7 = vpop.xlane.xlu0 %226 }
  0xae   : > { %451 = vmatpush3.msk.msra.mxu0 %vm222_vm1, %v227_v7 }
  0xaf   : > { %453 = vmatmul.mubr.msk.f32.vlgmr.msra.gmra.mrb[0].mxu0 %vm230_vm3, %v229_v6 }
 0x182   : > { %v303_v10 = vpop.f32.mrb[0].mxu0 }
 0x183   : > { %v307_v11 = vadd.f32 %v303_v10, %v228_v9  ;;  %v454_v12 = vpop.f32.mrb[1].mxu0 }
 0x185   : > { %309 = vst.msk [vmem:[#allocation2] sm:$0xff] %vm216_vm0, %v307_v11 }
 0x18c   : > { %v313_v14 = vld [vmem:[#allocation2] sm:$0xff] }
 0x18d   : > { %v315_v15 = vadd.f32 %v314_v13, %v313_v14 }
 0x18f   : > { %v316_v16 = vmax.f32 %v315_v15, 0.0 }
 0x191   : > { %319 = vperm.xlu0 %513, %v316_v16  }
 0x210   : > { %v320_v17 = vpop.permute.xlu0 %319 }
 0x211   : > { %322 = vst [vmem:[%s198_s10] sm:$0xff] %v320_v17  ;;  %323 = vst [vmem:[%s198_s10 + $0x8] sm:$0xff] %v320_v17 }
 0x212   : > { %528 = shalt.err (!%p525_p5)
}
 0x213   : > { %s529_s30 = scalar_lea.hbm %s694_s23, 256  ;;  %s533_s6 = scalar_lea.hbm %s742_s3, 512 }
 0x214   : > { %p530_p6 = scmp.ne.s32.totalorder %s694_s23, %s529_s30  ;;  %p534_p10 = scmp.lt.u32.totalorder %s694_s23, %s742_s3 }
 0x215   : > { %p535_p11 = scmp.lt.u32.totalorder %s533_s6, %s529_s30  ;;  %p537_p13 = scmp.lt.u32.totalorder %s529_s30, %s694_s23 }
 0x216   : > { %p531_p7 = pnand %p530_p6, %p659_p4 }
 0x217   : > { %p536_p12 = por %p535_p11, %p534_p10 }
 0x218   : > { %p532_p9 = pneg %p531_p7 }
 0x219   : > { %p538_p0 = por %p537_p13, %p536_p12 }
 0x21b   : > { %p539_p1 = pnand %p538_p0, %p532_p9 }
 0x21d   : > { %542 = shalt.err (!%p539_p1)
}
 0x21e   : > { %455 = dma.vmem_to_hbm [thread:$0]  (%p659_p4), %s689_s11, 256, %s694_s23, %s325_s26  }
 0x21f PF: > { %p461_p2 = scmp.ge.s32.totalorder %s593_s17, 2  ;;  %s351_s9 = sand.u32 1, %s573_s12  }
 0x220   : > { %s352_s10 = scalar_lea.sflag [#allocation4], %s351_s9 }
 0x221   : > { %p458_p3 = pnand %p461_p2, %p666_p8 }
 0x223   : > { %568 = dma.done.wait (!%p458_p3), %s352_s10, 256  }
 0x224   : > { %570 = vsyncadd (!%p458_p3), %s352_s10, 4294967040  ;;  %s16_s17 = sadd.s32 1, %s593_s17   ;;  %s745_s12 = smov %s577_s13 }
 0x225   : > { %p13_p5 = scmp.ge.s32.totalorder %s16_s17, 4   ;;  %s746_s13 = smov %s581_s14 }
 0x226   : > { %s747_s14 = smov %s672_s25  ;;  %s748_s15 = smov %s589_s16 }
 0x227   : > { %s749_s16 = smov %s751_s20  ;;  %15 = sbr.rel (!%p13_p5) target bundleno = 4 (0x4), region = 78 }
 0x22e   :  { %357 = vsyncpa [#allocation4], 1 }
 0x22f   :  { %359 = vsyncpa [#allocation4 + $0x1], 1 }

</bundles_post_ra>
